<compile_context>
chip_gen: v5e
topology: v5e:2x2
jax: 0.10.0
libtpu: 0.0.40
codegen_flags: <defaults>
</compile_context>

<pallas_src>
import math
import functools

import jax
import jax.numpy as jnp
from jax import lax
from jax.experimental import pallas as pl
from jax.experimental.pallas import tpu as pltpu


def _choose_seq_tile(S: int, H: int) -> int:
    """Largest sequence tile (full S, or a multiple of 8) keeping one f32
    compute tile around <= 2.5 MiB so double-buffered x/out + elementwise
    temporaries fit scoped VMEM on v5e/v6e/v7x."""
    max_rows = max(8, (int(2.5 * 1024 * 1024) // 4) // max(H, 1))
    max_rows = min(max_rows, 1024)
    if S <= max_rows:
        return S                      # full-extent block is always legal
    return max(8, (max_rows // 8) * 8)  # tiled: sublane dim multiple of 8


def _pos_enc_kernel(x_ref, o_ref, *, scale: float, tile_rows: int,
                    hidden: int, neg_exp_k: float):
    # x_ref / o_ref: (TS, H) -- batch dim squeezed away by the BlockSpec.
    # Positional rows covered by this tile: [row0, row0 + TS).
    row0 = pl.program_id(0) * tile_rows
    rows = (lax.broadcasted_iota(jnp.int32, (tile_rows, hidden), 0)
            + row0).astype(jnp.float32)
    col_i = lax.broadcasted_iota(jnp.int32, (tile_rows, hidden), 1)
    # 10000**(-2c/H) == exp(c * (-2*ln(10000)/H))   (EUP, free under mem roofline)
    inv_denom = jnp.exp(col_i.astype(jnp.float32) * neg_exp_k)
    angle = rows * inv_denom
    pe = jnp.where((col_i & 1) == 0, jnp.sin(angle), jnp.cos(angle))

    xv = x_ref[...].astype(jnp.float32)
    o_ref[...] = (xv * scale + pe).astype(o_ref.dtype)


def positional_encoder(x: jnp.ndarray, hidden_size: int,
                       max_seq_len: int = 1500) -> jnp.ndarray:
    """x: (B, S, H). Returns x*sqrt(H) + pe[:S], same dtype as x."""
    B, S, H = x.shape
    assert H == hidden_size
    assert S <= max_seq_len

    ts = _choose_seq_tile(S, H)
    num_s = pl.cdiv(S, ts)

    scale = float(math.sqrt(hidden_size))
    neg_exp_k = -2.0 * math.log(10000.0) / float(hidden_size)
    kernel = functools.partial(_pos_enc_kernel, scale=scale, tile_rows=ts,
                               hidden=H, neg_exp_k=neg_exp_k)

    blk = (pl.Squeezed(), ts, H)          # kernel sees (TS, H)
    idx = lambda s, b: (b, s, 0)          # seq tile outer, batch inner

    return pl.pallas_call(
        kernel,
        out_shape=jax.ShapeDtypeStruct((B, S, H), x.dtype),
        grid_spec=pltpu.PrefetchScalarGridSpec(
            num_scalar_prefetch=0,
            grid=(num_s, B),
            in_specs=[pl.BlockSpec(blk, idx)],
            out_specs=pl.BlockSpec(blk, idx),
        ),
        compiler_params=pltpu.CompilerParams(
            dimension_semantics=("parallel", "parallel"),
            vmem_limit_bytes=48 * 1024 * 1024),
    )(x)


def _reference(x: jnp.ndarray, hidden_size: int, max_seq_len: int = 1500):
    """Pure-JAX replica of the PyTorch buffer + forward (source of truth)."""
    pos = jnp.arange(max_seq_len, dtype=jnp.float32)[:, None]
    col = jnp.arange(hidden_size, dtype=jnp.float32)[None, :]
    denom = jnp.power(10000.0, 2.0 * col / float(hidden_size))
    angle = pos / denom
    even = (jnp.arange(hidden_size) % 2 == 0)[None, :]
    pe = jnp.where(even, jnp.sin(angle), jnp.cos(angle))
    S = x.shape[1]
    return x * math.sqrt(hidden_size) + pe[None, :S, :].astype(x.dtype)


if __name__ == "__main__":
    B, S, H = 2, 8, 32            # batch, seq, hidden (small test shapes)
    key = jax.random.PRNGKey(0)
    x = jax.random.normal(key, (B, S, H), dtype=jnp.float32)

    out = positional_encoder(x, hidden_size=H, max_seq_len=1500)
    out = jax.block_until_ready(out)

    ref = _reference(x, hidden_size=H, max_seq_len=1500)
    assert out.shape == (B, S, H)
    assert out.dtype == x.dtype
    assert jnp.allclose(out, ref, atol=1e-4, rtol=1e-4), "mismatch vs reference"

    print("KERNEL_OK")
</pallas_src>

<mosaic_0001>
module attributes {stable_mosaic.version = 11 : i64} {
  func.func @_pos_enc_kernel(%arg0: i32, %arg1: i32, %arg2: memref<1x8x32xf32, #tpu.memory_space<vmem>>, %arg3: memref<1x8x32xf32, #tpu.memory_space<vmem>>) attributes {dimension_semantics = [#tpu.dimension_semantics<parallel>, #tpu.dimension_semantics<parallel>], iteration_bounds = array<i64: 1, 2>, scalar_prefetch = 0 : i64, scratch_operands = 0 : i64, tpu.core_type = #tpu.core_type<tc>, window_params = [{transform_indices = @transform_0, window_bounds = array<i64: 1, 8, 32>}, {transform_indices = @transform_1, window_bounds = array<i64: 1, 8, 32>}]} {
    %c8_i32 = arith.constant 8 : i32
    %0 = arith.muli %arg0, %c8_i32 : i32
    %1 = tpu.iota {dimensions = array<i32: 0>} : vector<8x32xi32>
    %2 = vector.broadcast %0 : i32 to vector<8x32xi32>
    %3 = arith.addi %1, %2 : vector<8x32xi32>
    %4 = arith.sitofp %3 : vector<8x32xi32> to vector<8x32xf32>
    %5 = tpu.iota {dimensions = array<i32: 1>} : vector<8x32xi32>
    %6 = arith.sitofp %5 : vector<8x32xi32> to vector<8x32xf32>
    %cst = arith.constant -0.575646281 : f32
    %7 = vector.broadcast %cst : f32 to vector<8x32xf32>
    %8 = arith.mulf %6, %7 : vector<8x32xf32>
    %9 = math.exp %8 : vector<8x32xf32>
    %10 = arith.mulf %4, %9 : vector<8x32xf32>
    %c1_i32 = arith.constant 1 : i32
    %11 = vector.broadcast %c1_i32 : i32 to vector<8x32xi32>
    %12 = arith.andi %5, %11 : vector<8x32xi32>
    %c0_i32 = arith.constant 0 : i32
    %13 = vector.broadcast %c0_i32 : i32 to vector<8x32xi32>
    %14 = arith.cmpi eq, %12, %13 : vector<8x32xi32>
    %15 = math.sin %10 : vector<8x32xf32>
    %16 = math.cos %10 : vector<8x32xf32>
    %17 = arith.select %14, %15, %16 : vector<8x32xi1>, vector<8x32xf32>
    %c0 = arith.constant 0 : index
    %c0_0 = arith.constant 0 : index
    %c0_1 = arith.constant 0 : index
    %18 = vector.load %arg2[%c0, %c0_0, %c0_1] : memref<1x8x32xf32, #tpu.memory_space<vmem>>, vector<1x8x32xf32>
    %19 = vector.shape_cast %18 : vector<1x8x32xf32> to vector<8x32xf32>
    %cst_2 = arith.constant 5.65685415 : f32
    %20 = vector.broadcast %cst_2 : f32 to vector<8x32xf32>
    %21 = arith.mulf %19, %20 : vector<8x32xf32>
    %22 = arith.addf %21, %17 : vector<8x32xf32>
    %c0_3 = arith.constant 0 : index
    %c0_4 = arith.constant 0 : index
    %c0_5 = arith.constant 0 : index
    %23 = vector.load %arg3[%c0_3, %c0_4, %c0_5] : memref<1x8x32xf32, #tpu.memory_space<vmem>>, vector<1x8x32xf32>
    %24 = vector.shape_cast %23 : vector<1x8x32xf32> to vector<8x32xf32>
    %25 = vector.shape_cast %22 : vector<8x32xf32> to vector<1x8x32xf32>
    tpu.vector_store %arg3[%c0_3, %c0_4, %c0_5], %25 {strides = array<i32>} : memref<1x8x32xf32, #tpu.memory_space<vmem>>, vector<1x8x32xf32>,
    return
  }
  func.func @transform_0(%arg0: i32, %arg1: i32) -> (i32, i32, i32) {
    %c0_i32 = arith.constant 0 : i32
    %c0_i32_0 = arith.constant 0 : i32
    return %arg1, %arg0, %c0_i32 : i32, i32, i32
  }
  func.func @transform_1(%arg0: i32, %arg1: i32) -> (i32, i32, i32) {
    %c0_i32 = arith.constant 0 : i32
    %c0_i32_0 = arith.constant 0 : i32
    return %arg1, %arg0, %c0_i32 : i32, i32, i32
  }
}

</mosaic_0001>

<bundles_post_ra>
// kernel: tpu_custom_call.1
= control target key start
LH: loop header
LB: loop body
LE: loop exit
PB: predicated region body
PF: predicated region fallthrough
CT: control target
= control target key end

     0   :  { %6 = vsyncpa [#allocation3], 0  ;;  %s976_s0 = inlined_call_operand.hbm [shape: f32[2,8,32], index: 0, kind: input, shape index: {}]   ;;  %s977_s1 = inlined_call_operand.hbm [shape: f32[2,8,32], index: 1, kind: output, shape index: {}]  }
   0x1   :  { %8 = vsyncpa [#allocation3 + $0x1], 0 }
   0x2   :  { %9 = vsyncpa [#allocation4], 0 }
   0x3   :  { %11 = vsyncpa [#allocation4 + $0x1], 0  ;;  %s799_s6 = smov 0   ;;  %s801_s7 = smov 0  }
   0x4   :  { %s803_s8 = smov 0   ;;  %s805_s9 = smov 0  }
   0x5   :  { %s807_s10 = smov 0   ;;  %s809_s11 = smov 0  }
   0x6 LB: > { %s578_s12 = sadd.s32 4294967295, %s780_s11   ;;  %s579_s13 = sadd.s32 4294967294, %s780_s11   ;;  %s780_s11 = sphi %s809_s11, %s17_s11   ;;  %s776_s10 = sphi %s807_s10, %s986_s10   ;;  %s772_s9 = sphi %s805_s9, %s985_s9   ;;  %s768_s8 = sphi %s803_s8, %s984_s8   ;;  %s764_s7 = sphi %s801_s7, %s983_s7   ;;  %s760_s6 = sphi %s799_s6, %s982_s6  }
   0x7   : > { %s26_s14 = sadd.s32 1, %s776_s10  ;;  %s38_s15 = sadd.s32 1, %s768_s8 }
   0x8   : > { %p27_p0 = scmp.ge.s32.totalorder %s26_s14, 2  ;;  %p45_p1 = scmp.ne.s32.totalorder %s768_s8, %s764_s7 }
   0x9   : > { %p46_p2 = scmp.eq.s32.totalorder %s780_s11, 0  ;;  %p51_p3 = scmp.ne.s32.totalorder %s764_s7, %s760_s6 }
   0xa   : > { %s988_s14 = smov (%p27_p0, %s26_s14), 0  ;;  %p52_p5 = scmp.eq.s32.totalorder %s578_s12, 0 }
   0xb   : > { %p840_p4 = por %p46_p2, %p45_p1  ;;  %s33_s17 = ssub.s32 %s776_s10, %s988_s14 }
   0xc   : > { %p77_p6 = scmp.eq.s32.totalorder %s578_s12, 1  ;;  %p36_p7 = scmp.eq.s32.totalorder %s33_s17, 0 }
   0xd   : > { %p846_p8 = por %p52_p5, %p51_p3  ;;  %p83_p10 = scmp.eq.s32.totalorder %s579_s13, 1 }
   0xe   : > { %p850_p9 = por %p77_p6, %p45_p1  ;;  %p581_p12 = scmp.ge.s32.totalorder %s780_s11, 2 }
   0xf   : > { %s855_s20 = scalar_select %p36_p7, %s768_s8, %s38_s15  }
  0x10   : > { %p857_p11 = por %p83_p10, %p51_p3  ;;  %p609_p13 = scmp.lt.s32.totalorder %s780_s11, 2 }
  0x11   : > { %s103_s22 = sand.u32 1, %s768_s8   ;;  %s583_s24 = sshll.u32 %s776_s10, 3 }
  0x12   : > { %s582_s23 = sshll.u32 %s103_s22, 3  ;;  %s112_s27 = scalar_lea.hbm %s976_s0, %s583_s24 }
  0x13   : > { %s107_s28 = scalar_lea.vmem [#allocation2], %s582_s23  ;;  %s114_s30 = sshll.u32 %s112_s27, 4  ;;  %s115_s30 = int_to_ptr.hbm [resolvable:$true] %s114_s30 }
  0x14   : > { %s116_s29 = sshll.u32 %s107_s28, 4  ;;  %p602_p0 = pnand %p609_p13, %p840_p4  ;;  %s117_s29 = int_to_ptr.vmem [resolvable:$true] %s116_s29 }
  0x15   : > { %p584_p1 = scmp.ge.s32.totalorder %s780_s11, 1  ;;  %p121_p2 = scmp.lt.s32.totalorder %s780_s11, 3 }
  0x16   : > { %s104_s2 = scalar_lea.sflag [#allocation3], %s103_s22 }
  0x17   : > { %604 = dma.hbm_to_vmem [thread:$0]  (!%p602_p0), %s115_s30, 128, %s117_s29, %s104_s2  }
  0x18   : > { %p122_p3 = pnand %p584_p1, %p121_p2 }
  0x19   : > { %s873_s3 = sand.u32 (!%p122_p3), 1, %s764_s7  }
  0x1a   : > { %125 = sbr.rel (%p122_p3) target bundleno = 153 (0x99), region = 24  ;;  %s585_s4 = sshll.u32 (!%p122_p3), %s873_s3, 3 }
  0x1b   : > { %s128_s5 = scalar_lea.sflag (!%p122_p3), [#allocation3], %s873_s3  ;;  %s879_s12 = scalar_lea.vmem (!%p122_p3), [#allocation2], %s585_s4 }
  0x1f   : > { %751 = dma.done.wait (%p846_p8), %s128_s5, 128  }
  0x20   : > { %753 = vsyncadd (%p846_p8), %s128_s5, 4294967168  ;;  %v152_v0 = vlaneseq  ;;  %v782_v20 = vmov 683565275   ;;  %v783_v22 = vmov 2475754826   ;;  %s594_s13 = sshll.u32 %s772_s9, 3 }
  0x21   : > { %v784_v24 = vmov 2131351028   ;;  %v785_v26 = vmov 2102212464   ;;  %v786_v28 = vmov 920167782   ;;  %s493_s17 = scalar_lea.hbm %s977_s1, %s594_s13 }
  0x22   : > { %v885_v1 = vand.u32 127, %v152_v0  ;;  %v153_v5 = vshrl.u32 %v152_v0, 7  ;;  %v787_v34 = vmov 1326507024   ;;  %s150_s9 = scalar_lea.vmem [#allocation5], %s585_s4  ;;  %s497_s22 = sshll.u32 %s493_s17, 4  ;;  %s498_s22 = int_to_ptr.hbm [resolvable:$true] %s497_s22 }
  0x23   : > { %s495_s18 = sshll.u32 %s150_s9, 4  ;;  %s482_s23 = scalar_lea.sflag [#allocation4], %s873_s3  ;;  %s496_s18 = int_to_ptr.vmem [resolvable:$true] %s495_s18 }
  0x24   : > { %v159_v2 = vcvt.s32.f32 %v885_v1  ;;  %v156_v6 = vcvt.s32.f32 %v153_v5  ;;  %s712_s24 = sshra.s32 %s498_s22, 4  ;;  %s718_s28 = scalar_lea.hbm %s977_s1, 16  ;;  %s713_s24 = int_to_ptr.hbm [resolvable:$true] %s712_s24 }
  0x25   : > { %s714_s25 = scalar_lea.hbm %s713_s24, 8  ;;  %p719_p7 = scmp.lt.s32.totalorder %s713_s24, %s977_s1 }
  0x26   : > { %v160_v3 = vmul.f32 -0.5756463, %v159_v2  ;;  %p715_p4 = scmp.ne.s32.totalorder %s713_s24, %s714_s25  ;;  %p720_p8 = scmp.lt.s32.totalorder %s718_s28, %s714_s25 }
  0x28   : > { %v161_v4 = vmul.f32 1.442695, %v160_v3  ;;  %p716_p5 = pnand %p715_p4, %p850_p9  ;;  %p721_p10 = por %p720_p8, %p719_p7 }
  0x2a   : > { %666 = vpow2.f32 %v161_v4  ;;  %p717_p6 = pneg %p716_p5 }
  0x2c   : > { %p722_p13 = pnand %p721_p10, %p717_p6 }
  0x30   : > { %v667_v7 = vpop.eup %666 }
  0x31   : > { %v888_v8 = vmul.f32 %v667_v7, %v156_v6 }
  0x33   : > { %v169_v9 = vand.u32 2139095040, %v888_v8  ;;  %v166_v11 = vand.u32 2147483647, %v888_v8  ;;  %vm168_vm12 = vcmp.lt.s32.totalorder %v888_v8, 0 }
  0x35   : > { %v170_v10 = vshrl.u32 %v169_v9, 23  ;;  %v173_v14 = vand.u32 8388607, %v166_v11  ;;  %vm167_vm13 = vcmp.le.f32.partialorder %v166_v11, 0.7853982 }
  0x37   : > { %v587_v12 = vadd.s32 4294967169, %v170_v10  ;;  %v174_v17 = vor.u32 8388608, %v173_v14  ;;  %v788_v10 = vmov 0  }
  0x39   : > { %v176_v13 = vadd.s32 1, %v587_v12  ;;  %v897_v36 = vshll.u32 %v174_v17, 8 }
  0x3b   : > { %vm177_vm0 = vcmp.gt.s32.totalorder %v176_v13, 0  ;;  %v215_v48 = vand.u32 65535, %v897_v36  ;;  %v216_v49 = vshrl.u32 %v897_v36, 16 }
  0x3c   : > { %v178_v15 = vsel %vm177_vm0, %v176_v13, 0 }
  0x3d   : > { %v180_v16 = vand.u32 31, %v178_v15  ;;  %v894_v18 = vshrl.u32 %v178_v15, 5 }
  0x3f   : > { %v181_v19 = vsub.s32 32, %v180_v16  ;;  %v183_v21 = vshll.u32 %v782_v20, %v180_v16  ;;  %v186_v23 = vshll.u32 %v783_v22, %v180_v16  ;;  %v189_v25 = vshll.u32 %v784_v24, %v180_v16 }
  0x40   : > { %v192_v27 = vshll.u32 %v785_v26, %v180_v16  ;;  %v195_v29 = vshll.u32 %v786_v28, %v180_v16  ;;  %vm198_vm1 = vcmp.lt.s32.totalorder %v894_v18, 1  ;;  %vm201_vm2 = vcmp.lt.s32.totalorder %v894_v18, 4 }
  0x41   : > { %v184_v30 = vshrl.u32 %v783_v22, %v181_v19  ;;  %v187_v31 = vshrl.u32 %v784_v24, %v181_v19  ;;  %v190_v32 = vshrl.u32 %v785_v26, %v181_v19  ;;  %v193_v33 = vshrl.u32 %v786_v28, %v181_v19 }
  0x42   : > { %v196_v35 = vshrl.u32 %v787_v34, %v181_v19  ;;  %vm200_vm3 = vcmp.lt.s32.totalorder %v894_v18, 3  ;;  %vm199_vm4 = vcmp.lt.s32.totalorder %v894_v18, 2  ;;  %v182_v56 = vshrl.u32 %v782_v20, %v181_v19 }
  0x43   : > { %v185_v37 = vor.u32 %v184_v30, %v183_v21  ;;  %v188_v38 = vor.u32 %v187_v31, %v186_v23  ;;  %v191_v39 = vor.u32 %v190_v32, %v189_v25  ;;  %v194_v40 = vor.u32 %v193_v33, %v192_v27 }
  0x44   : > { %v197_v41 = vor.u32 %v196_v35, %v195_v29 }
  0x45   : > { %v206_v42 = vsel %vm198_vm1, %v185_v37, %v188_v38  ;;  %v210_v43 = vsel %vm198_vm1, %v188_v38, %v191_v39  ;;  %v207_v44 = vsel %vm201_vm2, %v194_v40, 920167782  ;;  %v202_v6 = vsel %vm198_vm1, %v182_v56, %v185_v37 }
  0x46   : > { %v211_v45 = vsel %vm201_vm2, %v197_v41, 1326507024  ;;  %v208_v46 = vsel %vm200_vm3, %v191_v39, %v207_v44  ;;  %v203_v9 = vsel %vm201_vm2, %v191_v39, 2102212464 }
  0x47   : > { %v212_v47 = vsel %vm200_vm3, %v194_v40, %v211_v45  ;;  %v209_v50 = vsel %vm199_vm4, %v206_v42, %v208_v46  ;;  %v204_v21 = vsel %vm200_vm3, %v188_v38, %v203_v9 }
  0x48   : > { %v213_v51 = vsel %vm199_vm4, %v210_v43, %v212_v47  ;;  %v239_v54 = vand.u32 65535, %v209_v50  ;;  %v240_v55 = vshrl.u32 %v209_v50, 16  ;;  %v205_v29 = vsel %vm199_vm4, %v202_v6, %v204_v21  ;;  %v476_v21 = vld [vmem:[%s879_s12] sm:$0xff] }
  0x49   : > { %v217_v52 = vand.u32 65535, %v213_v51  ;;  %v218_v53 = vshrl.u32 %v213_v51, 16  ;;  %v259_v33 = vmul.u32 %v897_v36, %v205_v29  ;;  %vm309_vm4 = vweird.f32 %v888_v8 }
  0x4a   : > { %v241_v60 = vmul.u32 %v239_v54, %v215_v48  ;;  %v242_v61 = vmul.u32 %v240_v55, %v215_v48  ;;  %v243_v62 = vmul.u32 %v239_v54, %v216_v49  ;;  %v244_v3 = vmul.u32 %v240_v55, %v216_v49 }
  0x4b   : > { %v219_v57 = vmul.u32 %v217_v52, %v215_v48  ;;  %v220_v58 = vmul.u32 %v218_v53, %v215_v48  ;;  %v221_v59 = vmul.u32 %v217_v52, %v216_v49  ;;  %v222_v63 = vmul.u32 %v218_v53, %v216_v49 }
  0x4c   : > { %v245_v4 = vshll.u32 %v242_v61, 16  ;;  %v247_v5 = vshll.u32 %v243_v62, 16  ;;  %v246_v19 = vshrl.u32 %v242_v61, 16  ;;  %v248_v25 = vshrl.u32 %v243_v62, 16 }
  0x4d   : > { %v223_v0 = vshll.u32 %v220_v58, 16  ;;  %v225_v2 = vshll.u32 %v221_v59, 16  ;;  %v224_v14 = vshrl.u32 %v220_v58, 16  ;;  %v226_v22 = vshrl.u32 %v221_v59, 16 }
  0x4e   : > { %vm249_vm6 = vc.u32 %v241_v60, %v245_v4  ;;  %v251_v13 = vadd.s32 %v245_v4, %v241_v60 }
  0x4f   : > { %vm227_vm5 = vc.u32 %v219_v57, %v223_v0  ;;  %v229_v7 = vadd.s32 %v223_v0, %v219_v57  ;;  %v250_v16 = vsel %vm249_vm6, 1, %v788_v10  ;;  %vm479_vm6 = vcmask 261120  }
  0x50   : > { %v228_v12 = vsel %vm227_vm5, 1, %v788_v10  ;;  %v252_v20 = vadd.s32 %v250_v16, %v244_v3  ;;  %vm253_vm8 = vc.u32 %v251_v13, %v247_v5  ;;  %v255_v28 = vadd.s32 %v251_v13, %v247_v5 }
  0x51   : > { %v230_v15 = vadd.s32 %v228_v12, %v222_v63  ;;  %vm231_vm7 = vc.u32 %v229_v7, %v225_v2  ;;  %v254_v24 = vsel %vm253_vm8, 1, %v788_v10 }
  0x52   : > { %v232_v17 = vsel %vm231_vm7, 1, %v788_v10  ;;  %v256_v26 = vadd.s32 %v254_v24, %v252_v20 }
  0x53   : > { %v234_v23 = vadd.s32 %v232_v17, %v230_v15  ;;  %v164_v17 = vand.u32 1, %v885_v1 }
  0x54   : > { %v257_v30 = vadd.s32 %v256_v26, %v246_v19  ;;  %v477_v26 = vmul.f32 5.656854, %v476_v21 }
  0x55   : > { %v235_v27 = vadd.s32 %v234_v23, %v224_v14  ;;  %vm165_vm5 = vcmp.eq.s32.totalorder %v164_v17, 0 }
  0x56   : > { %v258_v32 = vadd.s32 %v257_v30, %v248_v25 }
  0x57   : > { %v236_v31 = vadd.s32 %v235_v27, %v226_v22 }
  0x58   : > { %v262_v34 = vadd.s32 1, %v258_v32 }
  0x59   : > { %vm261_vm9 = vc.u32 %v236_v31, %v255_v28  ;;  %v260_v18 = vadd.s32 %v255_v28, %v236_v31 }
  0x5a   : > { %v263_v35 = vsel %vm261_vm9, %v262_v34, %v258_v32 }
  0x5b   : > { %v264_v37 = vadd.s32 %v263_v35, %v259_v33 }
  0x5d   : > { %v265_v38 = vadd.s32 536870912, %v264_v37 }
  0x5f   : > { %v266_v39 = vshrl.u32 %v265_v38, 30 }
  0x61   : > { %v267_v40 = vshll.u32 %v266_v39, 30  ;;  %v290_v57 = vsub.s32 4, %v266_v39 }
  0x63   : > { %v268_v41 = vsub.s32 %v264_v37, %v267_v40  ;;  %v291_v60 = vsel %vm168_vm12, %v290_v57, %v266_v39 }
  0x64   : > { %v293_v63 = vsel %vm167_vm13, 0, %v291_v60 }
  0x65   : > { %vm269_vm10 = vcmp.lt.s32.totalorder %v268_v41, 0  ;;  %v270_v42 = vsub.s32 0, %v268_v41  ;;  %v310_v5 = vadd.s32 3, %v293_v63  ;;  %v465_v11 = vand.u32 3, %v293_v63 }
  0x67   : > { %v271_v43 = vsel %vm269_vm10, %v270_v42, %v268_v41  ;;  %v311_v12 = vand.u32 3, %v310_v5  ;;  %vm470_vm15 = vcmp.eq.s32.totalorder %v465_v11, 2  ;;  %vm467_vm2 = vcmp.eq.s32.totalorder %v465_v11, 0 }
  0x68   : > { %v272_v44 = vclz %v271_v43  ;;  %vm466_vm3 = vcmp.lt.s32.totalorder %v465_v11, 2 }
  0x69   : > { %vm316_vm14 = vcmp.eq.s32.totalorder %v311_v12, 2  ;;  %vm312_vm0 = vcmp.lt.s32.totalorder %v311_v12, 2  ;;  %vm313_vm1 = vcmp.eq.s32.totalorder %v311_v12, 0 }
  0x6a   : > { %v588_v45 = vadd.s32 4294967294, %v272_v44 }
  0x6c   : > { %vm589_vm11 = vcmp.lt.s32.totalorder %v588_v45, 0 }
  0x6d   : > { %v275_v46 = vsel %vm589_vm11, 0, %v588_v45 }
  0x6e   : > { %v276_v47 = vsub.s32 32, %v275_v46  ;;  %v277_v48 = vshll.u32 %v268_v41, %v275_v46  ;;  %v280_v49 = vsub.s32 4294967266, %v275_v46 }
  0x70   : > { %v278_v36 = vshrl.u32 %v260_v18, %v276_v47  ;;  %v281_v50 = vadd.s32 127, %v280_v49 }
  0x72   : > { %v279_v51 = vor.u32 %v278_v36, %v277_v48  ;;  %v282_v52 = vshll.u32 %v281_v50, 23 }
  0x74   : > { %v283_v53 = vor.u32 4788187, %v282_v52  ;;  %v286_v54 = vcvt.s32.f32 %v279_v51 }
  0x76   : > { %v284_v55 = vand.u32 2147483647, %v283_v53 }
  0x78   : > { %v287_v56 = vmul.f32 %v286_v54, %v284_v55 }
  0x7a   : > { %v288_v58 = vxor.u32 2147483648, %v287_v56 }
  0x7c   : > { %v289_v59 = vsel %vm168_vm12, %v288_v58, %v287_v56 }
  0x7d   : > { %v292_v61 = vsel %vm167_vm13, %v888_v8, %v289_v59 }
  0x7e   : > { %v294_v62 = vmul.f32 %v292_v61, %v292_v61 }
  0x80   : > { %v295_v0 = vmul.f32 -0.001358992, %v294_v62  ;;  %v302_v2 = vmul.f32 -0.00019511016, %v294_v62 }
  0x82   : > { %v296_v3 = vadd.f32 0.041655596, %v295_v0  ;;  %v303_v4 = vadd.f32 0.008332121, %v302_v2 }
  0x84   : > { %v297_v6 = vmul.f32 %v296_v3, %v294_v62  ;;  %v304_v7 = vmul.f32 %v303_v4, %v294_v62 }
  0x86   : > { %v298_v9 = vadd.f32 -0.4999988, %v297_v6  ;;  %v305_v10 = vadd.f32 -0.16666654, %v304_v7 }
  0x88   : > { %v299_v13 = vmul.f32 %v298_v9, %v294_v62  ;;  %v306_v14 = vmul.f32 %v305_v10, %v294_v62 }
  0x8a   : > { %v300_v15 = vadd.f32 1.0, %v299_v13  ;;  %v307_v16 = vadd.f32 1.0, %v306_v14 }
  0x8c   : > { %v308_v19 = vmul.f32 %v307_v16, %v292_v61  ;;  %v317_v20 = vxor.u32 2147483648, %v300_v15 }
  0x8e   : > { %v314_v22 = vxor.u32 2147483648, %v308_v19  ;;  %v318_v23 = vsel %vm316_vm14, %v317_v20, %v308_v19  ;;  %v472_v24 = vsel %vm470_vm15, %v317_v20, %v308_v19 }
  0x90   : > { %v315_v25 = vsel %vm313_vm1, %v300_v15, %v314_v22  ;;  %v469_v1 = vsel %vm467_vm2, %v300_v15, %v314_v22 }
  0x91   : > { %v319_v27 = vsel %vm312_vm0, %v315_v25, %v318_v23  ;;  %v473_v28 = vsel %vm466_vm3, %v469_v1, %v472_v24 }
  0x92   : > { %v320_v29 = vsel %vm309_vm4, nan, %v319_v27  ;;  %v474_v30 = vsel %vm309_vm4, nan, %v473_v28 }
  0x93   : > { %v475_v31 = vsel %vm165_vm5, %v320_v29, %v474_v30 }
  0x94   : > { %v478_v32 = vadd.f32 %v477_v26, %v475_v31 }
  0x96   : > { %480 = vst.msk [vmem:[%s150_s9] sm:$0xff] %vm479_vm6, %v478_v32 }
  0x97   : > { %725 = shalt.err (!%p722_p13)
}
  0x98   : > { %599 = dma.vmem_to_hbm [thread:$0]  (%p850_p9), %s496_s18, 128, %s498_s22, %s482_s23  }
  0x99 PF: > { %s509_s2 = sand.u32 1, %s760_s6   ;;  %p606_p0 = pnand %p581_p12, %p857_p11 }
  0x9a   : > { %s510_s3 = scalar_lea.sflag [#allocation4], %s509_s2 }
  0x9b   : > { %p607_p1 = pneg %p606_p0 }
  0x9d   : > { %755 = dma.done.wait (%p607_p1), %s510_s3, 128  }
  0x9e   : > { %757 = vsyncadd (%p607_p1), %s510_s3, 4294967168  ;;  %s17_s11 = sadd.s32 1, %s780_s11   ;;  %s982_s6 = smov %s764_s7 }
  0x9f   : > { %p14_p2 = scmp.ge.s32.totalorder %s17_s11, 4   ;;  %s983_s7 = smov %s768_s8 }
  0xa0   : > { %s984_s8 = smov %s855_s20  ;;  %s985_s9 = smov %s776_s10 }
  0xa1   : > { %s986_s10 = smov %s988_s14  ;;  %16 = sbr.rel (!%p14_p2) target bundleno = 6 (0x6), region = 69 }
  0xa6   :  { %516 = vsyncpa [#allocation3], 1 }
  0xa7   :  { %518 = vsyncpa [#allocation3 + $0x1], 1 }
  0xa8   :  { %519 = vsyncpa [#allocation4], 1 }
  0xa9   :  { %521 = vsyncpa [#allocation4 + $0x1], 1 }

</bundles_post_ra>
